<compile_context>
chip_gen: v7x
topology: tpu7x:2x2x1
jax: 0.10.0
libtpu: 0.0.40
codegen_flags: <defaults>
</compile_context>

<pallas_src>
import functools

import jax
import jax.numpy as jnp
from jax import lax
from jax.experimental import pallas as pl
from jax.experimental.pallas import tpu as pltpu


def _round_up(x, m):
    return ((x + m - 1) // m) * m


def _choose_m_tile(mp, max_tile=1024):
    """Largest multiple of 128 that divides mp (mp is already a multiple of 128)."""
    t = min(max_tile, mp)
    t -= t % 128
    while mp % t:
        t -= 128
    return t


# ---------------------------------------------------------------------------
# Pallas kernel: decode one (no_pad, m_tile) tile of one (batch, anchor) slice
# ---------------------------------------------------------------------------
def _yolo_decode_kernel(p_ref, gxy_ref, anch_ref, io_ref, *, stride):
    """rows 0,1: (sigmoid+grid)*stride | rows 2,3: exp*anchor*stride | rows 4+: sigmoid.

    p_ref   : (no_pad, m_tile) raw predictions (VMEM block)
    gxy_ref : (2, m_tile)      grid-cell (x, y) per lane (VMEM block)
    anch_ref: (na, 2)          anchor_vec = anchors / stride (full array, SMEM)
    io_ref  : (no_pad, m_tile) decoded output block
    """
    a = pl.program_id(1)                      # anchor index of this block
    p = p_ref[...]                            # (no_pad, m_tile) f32
    sig = jax.nn.sigmoid(p)                   # one lane-dense EUP pass

    # xy rows
    io_ref[0:2, :] = (sig[0:2, :] + gxy_ref[...]) * stride

    # wh rows: exp only on these 2 rows; per-row anchor scalar from SMEM
    aw = anch_ref[a, 0] * stride
    ah = anch_ref[a, 1] * stride
    row = lax.broadcasted_iota(jnp.int32, (2, p.shape[1]), 0)
    io_ref[2:4, :] = jnp.exp(p[2:4, :]) * jnp.where(row == 0, aw, ah)

    # objectness + class scores ('default' arc)
    io_ref[4:, :] = sig[4:, :]


# ---------------------------------------------------------------------------
# YOLOLayer.forward (inference path: training=False, ONNX_EXPORT=False)
# ---------------------------------------------------------------------------
def yolo_layer_forward(p, anchors, img_size, *, nc, arc='default', training=False):
    """p: (bs, na*no, ny, nx) f32 (NCHW conv output), anchors: (na, 2) f32.

    Returns (io, p_perm):
      io     : (bs, na*ny*nx, no) decoded boxes
      p_perm : (bs, na, ny, nx, no) permuted raw predictions (torch's `p`)
    """
    bs, c, ny, nx = p.shape
    na = int(anchors.shape[0])
    no = nc + 5
    assert c == na * no, (c, na, no)
    stride = float(max(img_size)) / float(max(ny, nx))

    M = ny * nx
    # Pure reshape (no transpose): channels split into (na, no), spatial flattened.
    p4 = p.reshape(bs, na, no, M)

    p_perm = jnp.transpose(p4.reshape(bs, na, no, ny, nx), (0, 1, 3, 4, 2))
    if training:
        return p_perm
    if 'default' not in arc:
        # TODO(synk): 'BCE' / 'CE' arc variants and ONNX_EXPORT branch not implemented.
        raise NotImplementedError("only the 'default' arc inference path is implemented")

    # Pad ONCE to an (8,128)-tileable slab (head tensors are tiny; this is the
    # only pad/unpad round-trip in the whole layer).
    no_p = _round_up(no, 8)
    Mp = _round_up(M, 128)
    m_tile = _choose_m_tile(Mp)
    p_pad = p4
    if (no_p, Mp) != (no, M):
        p_pad = jnp.pad(p4, ((0, 0), (0, 0), (0, no_p - no), (0, Mp - M)))

    # Grid-cell coordinates on the lane axis: column m -> cell (y, x) = (m//nx, m%nx).
    mm = jnp.arange(Mp, dtype=jnp.int32)
    gxy = jnp.stack([(mm % nx).astype(jnp.float32),
                     (mm // nx).astype(jnp.float32)], axis=0)          # (2, Mp)

    anchor_vec = (anchors.astype(jnp.float32) / stride)                # (na, 2) -> SMEM

    grid = (bs, na, Mp // m_tile)
    blk = pl.BlockSpec((None, None, no_p, m_tile), lambda b, a, m: (b, a, 0, m))

    io_pad = pl.pallas_call(
        functools.partial(_yolo_decode_kernel, stride=stride),
        out_shape=jax.ShapeDtypeStruct((bs, na, no_p, Mp), jnp.float32),
        grid=grid,
        in_specs=[
            blk,                                                        # predictions
            pl.BlockSpec((2, m_tile), lambda b, a, m: (0, m)),          # grid xy
            pl.BlockSpec(memory_space=pltpu.MemorySpace.SMEM),          # anchors (scalars)
        ],
        out_specs=blk,
        compiler_params=pltpu.CompilerParams(
            dimension_semantics=("parallel", "parallel", "parallel"),
            vmem_limit_bytes=32 * 1024 * 1024),
    )(p_pad, gxy, anchor_vec)

    # Single required permute to the PyTorch output layout, then flatten boxes.
    io = jnp.transpose(io_pad[:, :, :no, :M], (0, 1, 3, 2)).reshape(bs, na * M, no)
    if nc == 1:
        io = io.at[..., 5].set(1.0)
    return io, p_perm


# ---------------------------------------------------------------------------
# Pure-JAX reference (mirrors the PyTorch eval-path math) for validation
# ---------------------------------------------------------------------------
def yolo_layer_reference(p, anchors, img_size, *, nc):
    bs, c, ny, nx = p.shape
    na = int(anchors.shape[0])
    no = nc + 5
    stride = float(max(img_size)) / float(max(ny, nx))
    pv = jnp.transpose(p.reshape(bs, na, no, ny, nx), (0, 1, 3, 4, 2))
    yv, xv = jnp.meshgrid(jnp.arange(ny, dtype=jnp.float32),
                          jnp.arange(nx, dtype=jnp.float32), indexing='ij')
    grid_xy = jnp.stack((xv, yv), axis=-1).reshape(1, 1, ny, nx, 2)
    anchor_wh = (anchors.astype(jnp.float32) / stride).reshape(1, na, 1, 1, 2)
    xy = (jax.nn.sigmoid(pv[..., :2]) + grid_xy) * stride
    wh = jnp.exp(pv[..., 2:4]) * anchor_wh * stride
    rest = jax.nn.sigmoid(pv[..., 4:])
    io = jnp.concatenate([xy, wh, rest], axis=-1)
    if nc == 1:
        io = io.at[..., 5].set(1.0)
    return io.reshape(bs, -1, no), pv


# ---------------------------------------------------------------------------
if __name__ == "__main__":
    key = jax.random.PRNGKey(0)
    bs, nc = 2, 2
    no = nc + 5
    img_size = (256, 256)

    # Two detection heads (like a real YOLO): stride-32 and stride-16 grids.
    heads = [
        (jnp.array([(10., 14.), (23., 27.), (37., 58.)], jnp.float32), 8, 8),
        (jnp.array([(5., 7.), (10., 13.), (16., 23.)], jnp.float32), 16, 16),
    ]

    ios = []
    for idx, (anchors, ny, nx) in enumerate(heads):
        na = int(anchors.shape[0])
        p_in = 0.5 * jax.random.normal(jax.random.fold_in(key, idx),
                                       (bs, na * no, ny, nx), jnp.float32)

        io, p_perm = yolo_layer_forward(p_in, anchors, img_size, nc=nc)
        io = jax.block_until_ready(io)
        p_perm = jax.block_until_ready(p_perm)

        io_ref, p_ref = yolo_layer_reference(p_in, anchors, img_size, nc=nc)

        assert io.shape == (bs, na * ny * nx, no), io.shape
        assert p_perm.shape == (bs, na, ny, nx, no), p_perm.shape
        assert bool(jnp.allclose(io, io_ref, rtol=1e-5, atol=1e-4)), "io mismatch"
        assert bool(jnp.allclose(p_perm, p_ref)), "p mismatch"
        ios.append(io)

    total = jnp.concatenate(ios, axis=1)
    jax.block_until_ready(total)
    assert total.shape == (bs, 3 * 8 * 8 + 3 * 16 * 16, no), total.shape
    print("KERNEL_OK")
</pallas_src>

<mosaic_0001>
module attributes {stable_mosaic.version = 11 : i64} {
  func.func @_yolo_decode_kernel(%arg0: i32, %arg1: i32, %arg2: i32, %arg3: memref<1x1x8x128xf32, #tpu.memory_space<vmem>>, %arg4: memref<2x128xf32, #tpu.memory_space<vmem>>, %arg5: memref<3x2xf32, #tpu.memory_space<smem>>, %arg6: memref<1x1x8x128xf32, #tpu.memory_space<vmem>>) attributes {dimension_semantics = [#tpu.dimension_semantics<parallel>, #tpu.dimension_semantics<parallel>, #tpu.dimension_semantics<parallel>], iteration_bounds = array<i64: 2, 3, 1>, scalar_prefetch = 0 : i64, scratch_operands = 0 : i64, tpu.core_type = #tpu.core_type<tc>, window_params = [{transform_indices = @transform_0, window_bounds = array<i64: 1, 1, 8, 128>}, {transform_indices = @transform_1, window_bounds = array<i64: 2, 128>}, {transform_indices = @transform_2, window_bounds = array<i64: 3, 2>}, {transform_indices = @transform_3, window_bounds = array<i64: 1, 1, 8, 128>}]} {
    %c0 = arith.constant 0 : index
    %c0_0 = arith.constant 0 : index
    %c0_1 = arith.constant 0 : index
    %c0_2 = arith.constant 0 : index
    %0 = vector.load %arg3[%c0, %c0_0, %c0_1, %c0_2] : memref<1x1x8x128xf32, #tpu.memory_space<vmem>>, vector<1x1x8x128xf32>
    %1 = vector.shape_cast %0 : vector<1x1x8x128xf32> to vector<8x128xf32>
    %2 = arith.negf %1 : vector<8x128xf32>
    %3 = math.exp %2 : vector<8x128xf32>
    %cst = arith.constant 1.000000e+00 : f32
    %4 = vector.broadcast %cst : f32 to vector<8x128xf32>
    %5 = arith.addf %4, %3 : vector<8x128xf32>
    %6 = arith.divf %4, %5 : vector<8x128xf32>
    %7 = vector.extract_strided_slice %6 {offsets = [0, 0], sizes = [2, 128], strides = [1, 1]} : vector<8x128xf32> to vector<2x128xf32>
    %c0_3 = arith.constant 0 : index
    %c0_4 = arith.constant 0 : index
    %8 = vector.load %arg4[%c0_3, %c0_4] : memref<2x128xf32, #tpu.memory_space<vmem>>, vector<2x128xf32>
    %9 = arith.addf %7, %8 : vector<2x128xf32>
    %cst_5 = arith.constant 3.200000e+01 : f32
    %10 = vector.broadcast %cst_5 : f32 to vector<2x128xf32>
    %11 = arith.mulf %9, %10 : vector<2x128xf32>
    %c0_6 = arith.constant 0 : index
    %c0_7 = arith.constant 0 : index
    %c0_8 = arith.constant 0 : index
    %c0_9 = arith.constant 0 : index
    %12 = vector.load %arg6[%c0_6, %c0_7, %c0_8, %c0_9] : memref<1x1x8x128xf32, #tpu.memory_space<vmem>>, vector<1x1x2x128xf32>
    %13 = vector.shape_cast %12 : vector<1x1x2x128xf32> to vector<2x128xf32>
    %14 = vector.shape_cast %11 : vector<2x128xf32> to vector<1x1x2x128xf32>
    tpu.vector_store %arg6[%c0_6, %c0_7, %c0_8, %c0_9], %14 {strides = array<i32>} : memref<1x1x8x128xf32, #tpu.memory_space<vmem>>, vector<1x1x2x128xf32>,
    %15 = arith.index_cast %arg1 : i32 to index
    %c0_10 = arith.constant 0 : index
    %16 = memref.load %arg5[%15, %c0_10] : memref<3x2xf32, #tpu.memory_space<smem>>
    %cst_11 = arith.constant 3.200000e+01 : f32
    %17 = arith.mulf %16, %cst_11 : f32
    %18 = arith.index_cast %arg1 : i32 to index
    %c1 = arith.constant 1 : index
    %19 = memref.load %arg5[%18, %c1] : memref<3x2xf32, #tpu.memory_space<smem>>
    %cst_12 = arith.constant 3.200000e+01 : f32
    %20 = arith.mulf %19, %cst_12 : f32
    %21 = tpu.iota {dimensions = array<i32: 0>} : vector<2x128xi32>
    %22 = vector.extract_strided_slice %1 {offsets = [2, 0], sizes = [2, 128], strides = [1, 1]} : vector<8x128xf32> to vector<2x128xf32>
    %23 = math.exp %22 : vector<2x128xf32>
    %c0_i32 = arith.constant 0 : i32
    %24 = vector.broadcast %c0_i32 : i32 to vector<2x128xi32>
    %25 = arith.cmpi eq, %21, %24 : vector<2x128xi32>
    %26 = vector.broadcast %17 : f32 to vector<2x128xf32>
    %27 = vector.broadcast %20 : f32 to vector<2x128xf32>
    %28 = arith.select %25, %26, %27 : vector<2x128xi1>, vector<2x128xf32>
    %29 = arith.mulf %23, %28 : vector<2x128xf32>
    %c0_13 = arith.constant 0 : index
    %c0_14 = arith.constant 0 : index
    %c2 = arith.constant 2 : index
    %c0_15 = arith.constant 0 : index
    %30 = vector.load %arg6[%c0_13, %c0_14, %c2, %c0_15] : memref<1x1x8x128xf32, #tpu.memory_space<vmem>>, vector<1x1x2x128xf32>
    %31 = vector.shape_cast %30 : vector<1x1x2x128xf32> to vector<2x128xf32>
    %32 = vector.shape_cast %29 : vector<2x128xf32> to vector<1x1x2x128xf32>
    tpu.vector_store %arg6[%c0_13, %c0_14, %c2, %c0_15], %32 {strides = array<i32>} : memref<1x1x8x128xf32, #tpu.memory_space<vmem>>, vector<1x1x2x128xf32>,
    %33 = vector.extract_strided_slice %6 {offsets = [4, 0], sizes = [4, 128], strides = [1, 1]} : vector<8x128xf32> to vector<4x128xf32>
    %c0_16 = arith.constant 0 : index
    %c0_17 = arith.constant 0 : index
    %c4 = arith.constant 4 : index
    %c0_18 = arith.constant 0 : index
    %34 = vector.load %arg6[%c0_16, %c0_17, %c4, %c0_18] : memref<1x1x8x128xf32, #tpu.memory_space<vmem>>, vector<1x1x4x128xf32>
    %35 = vector.shape_cast %34 : vector<1x1x4x128xf32> to vector<4x128xf32>
    %36 = vector.shape_cast %33 : vector<4x128xf32> to vector<1x1x4x128xf32>
    tpu.vector_store %arg6[%c0_16, %c0_17, %c4, %c0_18], %36 {strides = array<i32>} : memref<1x1x8x128xf32, #tpu.memory_space<vmem>>, vector<1x1x4x128xf32>,
    return
  }
  func.func @transform_0(%arg0: i32, %arg1: i32, %arg2: i32) -> (i32, i32, i32, i32) {
    %c0_i32 = arith.constant 0 : i32
    %c0_i32_0 = arith.constant 0 : i32
    return %arg0, %arg1, %c0_i32, %arg2 : i32, i32, i32, i32
  }
  func.func @transform_1(%arg0: i32, %arg1: i32, %arg2: i32) -> (i32, i32) {
    %c0_i32 = arith.constant 0 : i32
    %c0_i32_0 = arith.constant 0 : i32
    return %c0_i32, %arg2 : i32, i32
  }
  func.func @transform_2(%arg0: i32, %arg1: i32, %arg2: i32) -> (i32, i32) {
    %c0_i32 = arith.constant 0 : i32
    %c0_i32_0 = arith.constant 0 : i32
    %c0_i32_1 = arith.constant 0 : i32
    return %c0_i32, %c0_i32_0 : i32, i32
  }
  func.func @transform_3(%arg0: i32, %arg1: i32, %arg2: i32) -> (i32, i32, i32, i32) {
    %c0_i32 = arith.constant 0 : i32
    %c0_i32_0 = arith.constant 0 : i32
    return %arg0, %arg1, %c0_i32, %arg2 : i32, i32, i32, i32
  }
}

</mosaic_0001>

<bundles_post_ra>
// kernel: tpu_custom_call.1
= control target key start
LH: loop header
LB: loop body
LE: loop exit
PB: predicated region body
PF: predicated region fallthrough
CT: control target
= control target key end

     0   :  { %s928_s0 = inlined_call_operand.hbm [shape: f32[2,3,8,128], index: 0, kind: input, shape index: {}]   ;;  %s929_s1 = inlined_call_operand.vmem [shape: f32[2,128], index: 1, kind: input, shape index: {}]   ;;  %s930_s2 = inlined_call_operand.vmem [shape: f32[3,2], index: 2, kind: input, shape index: {}]   ;;  %s931_s3 = inlined_call_operand.hbm [shape: f32[2,3,8,128], index: 3, kind: output, shape index: {}]  }
   0x1   :  { %939 = sst [smem:[#allocation14_spill]] %s930_s2 }
   0x2   :  { %8 = vsyncpa [#allocation3], 0 }
   0x3   :  { %10 = vsyncpa [#allocation3 + $0x1], 0 }
   0x4   :  { %11 = vsyncpa [#allocation5], 0 }
   0x5   :  { %12 = vsyncpa [#allocation4], 0 }
   0x6   :  { %14 = vsyncpa [#allocation4 + $0x1], 0  ;;  %s699_s12 = smov 0   ;;  %s701_s13 = smov 0  }
   0x7   :  { %s703_s14 = smov 0   ;;  %s705_s15 = smov 0  }
   0x8   :  { %s707_s16 = smov 0   ;;  %s709_s17 = smov 0  }
   0x9   :  { %s711_s18 = smov 0   ;;  %s713_s19 = smov 0  }
   0xa LB: > { %940 = sst [smem:[#allocation11_spill]] %s646_s12  ;;  %s412_s20 = sadd.s32 4294967295, %s674_s19   ;;  %s674_s19 = sphi %s713_s19, %s20_s19   ;;  %s670_s18 = sphi %s711_s18, %s966_s18   ;;  %s666_s17 = sphi %s709_s17, %s965_s17   ;;  %s662_s16 = sphi %s707_s16, %s964_s16   ;;  %s658_s15 = sphi %s705_s15, %s963_s15   ;;  %s654_s14 = sphi %s703_s14, %s962_s14   ;;  %s650_s13 = sphi %s701_s13, %s961_s13   ;;  %s646_s12 = sphi %s699_s12, %s960_s12  }
   0xb   : > { %s413_s21 = sadd.s32 4294967294, %s674_s19   ;;  %p63_p0 = scmp.ne.s32.totalorder %s650_s13, %s646_s12 }
   0xc   : > { %p743_p1 = scmp.eq.s32.totalorder %s412_s20, 0  ;;  %p747_p2 = scmp.eq.s32.totalorder %s412_s20, 5 }
   0xd   : > { %p144_p3 = scmp.eq.s32.totalorder %s413_s21, 5  ;;  %p414_p5 = scmp.ge.s32.totalorder %s674_s19, 1 }
   0xe   : > { %s941_s22 = scalar_select %p743_p1, 1, 0 }
   0xf   : > { %s942_s23 = scalar_select %p747_p2, 1, 0 }
  0x10   : > { %p753_p4 = por %p743_p1, %p63_p0  ;;  %p758_p6 = por %p144_p3, %p63_p0 }
  0x11   : > { %p151_p7 = scmp.lt.s32.totalorder %s674_s19, 7  ;;  %s946_s2 = sld [smem:[#allocation14_spill]] }
  0x12   : > { %s943_s24 = scalar_select %p753_p4, 1, 0 }
  0x13   : > { %s944_s25 = scalar_select %p758_p6, 1, 0 }
  0x14   : > { %p766_p8 = pnand %p414_p5, %p151_p7  ;;  %s35_s30 = sadd.s32 1, %s666_s17 }
  0x15   : > { %945 = sst [smem:[#allocation12_spill]] %s944_s25 }
  0x16   : > { %p440_p9 = pneg %p766_p8 }
  0x17   : > { %s171_s28 = sshll.u32 %s946_s2, 4  ;;  %s172_s28 = int_to_ptr.vmem [resolvable:$true] %s171_s28 }
  0x18   : > { %p441_p10 = pnand %p440_p9, %p743_p1  ;;  %s527_s4 = scalar_lea.vmem %s172_s28, 64 }
  0x19   : > { %p528_p11 = scmp.ne.s32.totalorder %s172_s28, %s527_s4  ;;  %p535_p3 = scmp.lt.s32.totalorder %s172_s28, %s172_s28 }
  0x1a   : > { %p529_p12 = pneg %p441_p10  ;;  %p536_p6 = scmp.lt.s32.totalorder %s527_s4, %s527_s4 }
  0x1c   : > { %p530_p13 = pnand %p529_p12, %p528_p11  ;;  %p537_p4 = por %p536_p6, %p535_p3 }
  0x1e   : > { %p531_p0 = pneg %p530_p13 }
  0x20   : > { %p538_p2 = pnand %p537_p4, %p531_p0 }
  0x22   : > { %541 = shalt.err (!%p538_p2)
}
  0x23   : > { %s676_s5 = smov [#allocation6]   ;;  %p37_p5 = scmp.ge.s32.totalorder %s35_s30, 3 }
  0x24   : > { %443 = dma.vmem_to_smem (!%p441_p10), %s172_s28, 64, %s676_s5, [#allocation5]  }
  0x25   : > { %s39_s6 = sadd.s32 1, %s670_s18  ;;  %s50_s7 = sadd.s32 1, %s654_s14 }
  0x26   : > { %p57_p6 = scmp.ne.s32.totalorder %s654_s14, %s650_s13  ;;  %s968_s30 = smov (%p37_p5, %s35_s30), 0 }
  0x27   : > { %948 = sst [smem:[#allocation13_spill]] %s968_s30  ;;  %s970_s6 = smov (!%p37_p5, %s39_s6), %s670_s18 }
  0x28   : > { %s44_s8 = ssub.s32 %s666_s17, %s968_s30  ;;  %p58_p2 = scmp.eq.s32.totalorder %s674_s19, 0 }
  0x29   : > { %p41_p4 = scmp.ge.s32.totalorder %s970_s6, 2  ;;  %p949_p7 = scmp.ne.s32.totalorder %s942_s23, 0 }
  0x2a   : > { %p791_p10 = por %p58_p2, %p57_p6  ;;  %p453_p11 = scmp.lt.s32.totalorder %s674_s19, 6 }
  0x2b   : > { %p787_p9 = por %p949_p7, %p57_p6  ;;  %s972_s6 = smov (%p41_p4, %s970_s6), 0 }
  0x2c   : > { %s182_s11 = sand.u32 1, %s654_s14   ;;  %s430_s20 = smul.u32 3, %s670_s18 }
  0x2d   : > { %s950_s9 = scalar_select %p787_p9, 1, 0 }
  0x2e   : > { %s43_s21 = ssub.s32 %s670_s18, %s972_s6  ;;  %s418_s27 = sshll.u32 %s182_s11, 3 }
  0x2f   : > { %s45_s26 = sor.u32 %s44_s8, %s43_s21  ;;  %s192_s23 = sadd.s32 %s666_s17, %s430_s20 }
  0x30   : > { %p48_p12 = scmp.eq.s32.totalorder %s45_s26, 0  ;;  %s186_s28 = scalar_lea.vmem [#allocation2], %s418_s27 }
  0x31   : > { %s196_s4 = sshll.u32 %s186_s28, 4  ;;  %s419_s2 = sshll.u32 %s192_s23, 7  ;;  %s806_s4 = int_to_ptr.vmem [resolvable:$true] %s196_s4 }
  0x32   : > { %s804_s5 = scalar_select %p48_p12, %s654_s14, %s50_s7  }
  0x33   : > { %s811_s12 = scalar_lea.hbm %s928_s0, %s419_s2  ;;  %p817_p13 = pnand %p453_p11, %p791_p10 }
  0x34   : > { %s183_s7 = scalar_lea.sflag [#allocation3], %s182_s11  ;;  %s542_s20 = scalar_lea.hbm %s811_s12, 128 }
  0x35   : > { %p543_p0 = scmp.ne.s32.totalorder %s811_s12, %s542_s20  ;;  %p544_p3 = pneg %p817_p13 }
  0x36   : > { %s547_s30 = scalar_lea.hbm %s928_s0, 768  ;;  %p548_p2 = scmp.lt.u32.totalorder %s811_s12, %s928_s0 }
  0x37   : > { %p545_p5 = pnand %p544_p3, %p543_p0  ;;  %p549_p4 = scmp.lt.u32.totalorder %s547_s30, %s542_s20 }
  0x38   : > { %p551_p10 = scmp.lt.u32.totalorder %s542_s20, %s811_s12 }
  0x39   : > { %p546_p6 = pneg %p545_p5  ;;  %p550_p7 = por %p549_p4, %p548_p2 }
  0x3b   : > { %p552_p11 = por %p551_p10, %p550_p7 }
  0x3d   : > { %p553_p12 = pnand %p552_p11, %p546_p6 }
  0x3f   : > { %556 = shalt.err (!%p553_p12)
}
  0x40   : > { %s557_s11 = scalar_lea.vmem %s806_s4, 128  ;;  %s677_s26 = smov [#allocation2]  }
  0x41   : > { %p558_p0 = scmp.ne.s32.totalorder %s806_s4, %s557_s11  ;;  %s562_s27 = sshll.u32 %s677_s26, 4  ;;  %s563_s27 = int_to_ptr.vmem [resolvable:$false] %s562_s27 }
  0x42   : > { %s564_s23 = scalar_lea.vmem %s563_s27, 256  ;;  %p565_p1 = scmp.lt.s32.totalorder %s806_s4, %s563_s27 }
  0x43   : > { %p560_p5 = pnand %p558_p0, %p544_p3  ;;  %p566_p2 = scmp.lt.s32.totalorder %s564_s23, %s557_s11 }
  0x45   : > { %p561_p9 = pneg %p560_p5  ;;  %p567_p4 = por %p566_p2, %p565_p1 }
  0x47   : > { %p568_p7 = pnand %p567_p4, %p561_p9 }
  0x49   : > { %571 = shalt.err (!%p568_p7)
}
  0x4a   : > { %447 = dma.hbm_to_vmem [thread:$0]  (!%p817_p13), %s811_s12, 128, %s806_s4, %s183_s7  }
  0x4b   : > { %205 = sbr.rel (%p766_p8) target bundleno = 133 (0x85), region = 32  ;;  %s849_s28 = sand.u32 (!%p766_p8), 1, %s650_s13  }
  0x4c   : > { %s421_s20 = sshll.u32 (!%p766_p8), %s849_s28, 3  ;;  %s208_s2 = scalar_lea.sflag (!%p766_p8), [#allocation3], %s849_s28 }
  0x4d   : > { %s211_s25 = scalar_lea.vmem (!%p766_p8), [#allocation2], %s421_s20  ;;  %p953_p1 = scmp.ne.s32.totalorder (!%p766_p8), %s943_s24, 0 }
  0x52   : > { %633 = dma.done.wait (%p953_p1), %s208_s2, 128  }
  0x53   : > { %635 = vsyncadd (%p953_p1), %s208_s2, 4294967168  ;;  %p954_p9 = scmp.ne.s32.totalorder %s941_s22, 0 }
  0x55   : > { %637 = dma.done.wait (%p954_p9), [#allocation5], 64  }
  0x56   : > { %639 = vsyncadd (%p954_p9), [#allocation5], 4294967232 }
  0x57   : > { %220 = sfence }
  0x58   : > { %v247_v0 = vld [vmem:[%s211_s25] sm:$0xff]  ;;  %s425_s12 = sshll.u32 %s658_s15, 7  ;;  %v264_v2 = vlaneseq  ;;  %s242_s22 = scalar_lea.vmem [#allocation7], %s421_s20 }
  0x59   : > { %v424_v1 = vmul.f32 -1.442695, %v247_v0  ;;  %s259_s29 = sld [smem:[#allocation6 + %s425_s12]]  ;;  %v266_v3 = vmul.f32 1.442695, %v247_v0  ;;  %s261_s4 = sadd.s32 1, %s425_s12 }
  0x5a   : > { %s262_s8 = sld [smem:[#allocation6 + %s261_s4]]  ;;  %v265_v4 = vshrl.u32 %v264_v2, 7  ;;  %s431_s30 = smul.u32 3, %s662_s16  ;;  %v254_v13 = vld [vmem:[%s929_s1] sm:$0x3] }
  0x5b   : > { %521 = vpow2.f32 %v424_v1  ;;  %s295_s26 = sshll.u32 %s242_s22, 4  ;;  %p955_p13 = scmp.ne.s32.totalorder %s950_s9, 0  ;;  %s871_s26 = int_to_ptr.vmem [resolvable:$true] %s295_s26 }
  0x5c   : > { %523 = vpow2.f32 %v266_v3  ;;  %vm268_vm0 = vcmp.eq.s32.totalorder %v265_v4, 0  ;;  %s291_s10 = sadd.s32 %s658_s15, %s431_s30  ;;  %s279_s15 = scalar_lea.sflag [#allocation4], %s849_s28 }
  0x5d   : > { %s427_s27 = sshll.u32 %s291_s10, 7  ;;  %s572_s2 = scalar_lea.vmem %s871_s26, 128 }
  0x5e   : > { %s876_s16 = scalar_lea.hbm %s931_s3, %s427_s27  ;;  %p573_p8 = scmp.ne.s32.totalorder %s871_s26, %s572_s2 }
  0x5f   : > { %s260_s24 = smul.f32 32.0, %s259_s29  ;;  %s678_s25 = smov [#allocation7]  }
  0x60   : > { %s263_s7 = smul.f32 32.0, %s262_s8  ;;  %p574_p3 = pnand %p573_p8, %p955_p13 }
  0x61   : > { %v269_v5 = vstv %s260_s24  ;;  %s576_s12 = sshll.u32 %s678_s25, 4  ;;  %s577_s12 = int_to_ptr.vmem [resolvable:$false] %s576_s12 }
  0x62   : > { %v270_v6 = vstv %s263_s7  ;;  %p575_p6 = pneg %p574_p3  ;;  %s578_s29 = scalar_lea.vmem %s577_s12, 256 }
  0x63   : > { %v271_v7 = vsel %vm268_vm0, %v269_v5, %v270_v6  ;;  %p579_p10 = scmp.lt.s32.totalorder %s871_s26, %s577_s12  ;;  %p580_p11 = scmp.lt.s32.totalorder %s578_s29, %s572_s2 }
  0x64   : > { %v273_v9 = vrot.slane %v271_v7, 6 }
  0x65   : > { %v522_v8 = vpop.eup %521  ;;  %p581_p12 = por %p580_p11, %p579_p10 }
  0x66   : > { %v524_v10 = vpop.eup %523  ;;  %v251_v11 = vadd.f32 1.0, %v522_v8 }
  0x67   : > { %v275_v12 = vmul.f32 %v524_v10, %v273_v9  ;;  %p582_p0 = pnand %p581_p12, %p575_p6 }
  0x68   : > { %525 = vrcp.f32 %v251_v11 }
  0x69   : > { %276 = vst [vmem:[%s242_s22] sm:$0xc] %v275_v12 }
  0x72   : > { %v526_v14 = vpop.eup %525 }
  0x73   : > { %v255_v15 = vadd.f32 %v526_v14, %v254_v13  ;;  %277 = vst [vmem:[%s242_s22] sm:$0xf0] %v526_v14 }
  0x75   : > { %v256_v16 = vmul.f32 32.0, %v255_v15 }
  0x77   : > { %257 = vst [vmem:[%s242_s22] sm:$0x3] %v256_v16 }
  0x78   : > { %585 = shalt.err (!%p582_p0)
}
  0x79   : > { %s586_s28 = scalar_lea.hbm %s876_s16, 128  ;;  %s590_s24 = scalar_lea.hbm %s931_s3, 768 }
  0x7a   : > { %p587_p5 = scmp.ne.s32.totalorder %s876_s16, %s586_s28  ;;  %p591_p7 = scmp.lt.u32.totalorder %s876_s16, %s931_s3 }
  0x7b   : > { %p592_p1 = scmp.lt.u32.totalorder %s590_s24, %s586_s28  ;;  %p594_p8 = scmp.lt.u32.totalorder %s586_s28, %s876_s16 }
  0x7c   : > { %p588_p2 = pnand %p587_p5, %p955_p13 }
  0x7d   : > { %p593_p9 = por %p592_p1, %p591_p7 }
  0x7e   : > { %p589_p4 = pneg %p588_p2 }
  0x7f   : > { %p595_p3 = por %p594_p8, %p593_p9 }
  0x81   : > { %p596_p6 = pnand %p595_p3, %p589_p4 }
  0x83   : > { %599 = shalt.err (!%p596_p6)
}
  0x84   : > { %438 = dma.vmem_to_hbm [thread:$0]  (%p955_p13), %s871_s26, 128, %s876_s16, %s279_s15  }
  0x85 PF: > { %s956_s30 = sld [smem:[#allocation11_spill]]  ;;  %s957_s10 = sld [smem:[#allocation12_spill]] }
  0x86   : > { %p455_p10 = scmp.ge.s32.totalorder %s674_s19, 2 }
  0x8b   : > { %s307_s21 = sand.u32 1, %s956_s30   ;;  %p958_p11 = scmp.ne.s32.totalorder %s957_s10, 0 }
  0x8c   : > { %s308_s11 = scalar_lea.sflag [#allocation4], %s307_s21 }
  0x8d   : > { %p449_p12 = pnand %p455_p10, %p958_p11 }
  0x8f   : > { %641 = dma.done.wait (!%p449_p12), %s308_s11, 128  }
  0x90   : > { %643 = vsyncadd (!%p449_p12), %s308_s11, 4294967168  ;;  %s20_s19 = sadd.s32 1, %s674_s19   ;;  %s959_s9 = sld [smem:[#allocation13_spill]] }
  0x91   : > { %p17_p0 = scmp.ge.s32.totalorder %s20_s19, 8   ;;  %s960_s12 = smov %s650_s13 }
  0x92   : > { %s961_s13 = smov %s654_s14  ;;  %s962_s14 = smov %s804_s5 }
  0x93   : > { %s963_s15 = smov %s666_s17  ;;  %s964_s16 = smov %s670_s18 }
  0x94   : > { %s966_s18 = smov %s972_s6  ;;  %19 = sbr.rel (!%p17_p0) target bundleno = 10 (0xa), region = 85 }
  0x96   : > { %s965_s17 = smov %s959_s9 }
  0x9b   :  { %313 = vsyncpa [#allocation3], 1 }
  0x9c   :  { %315 = vsyncpa [#allocation3 + $0x1], 1 }
  0x9d   :  { %316 = vsyncpa [#allocation4], 1 }
  0x9e   :  { %318 = vsyncpa [#allocation4 + $0x1], 1 }
  0x9f   :  { %319 = vsyncpa [#allocation5], 1 }
  0xa0   :  { %321 = vsyncpa [#allocation5 + $0x1], 1 }

</bundles_post_ra>
